<compile_context>
chip_gen: v6e
topology: v6e:2x2x1
jax: 0.10.0
libtpu: 0.0.40
codegen_flags: <defaults>
</compile_context>

<pallas_src>
import jax
import jax.numpy as jnp
from jax import lax
from jax.experimental import pallas as pl
from jax.experimental.pallas import tpu as pltpu

NUM_NODE_FEATURES = 64
NUM_CLASSES = 10
LANE = 128                      # padded hidden / class width (vreg lane count)
NEG_BIG = -1e30                 # mask value for padded class columns


def gcn_kernel(a_ref, x_ref, w1_ref, b1_ref, w2_ref, b2_ref, o_ref):
    a = a_ref[...]                                    # [N, N]   bf16 adjacency
    x = x_ref[...]                                    # [N, F]   bf16 features

    # ---- conv1: A_hat @ (X @ W1) + b1  (bf16 in, f32 accumulate) ----
    h = jnp.dot(x, w1_ref[...], preferred_element_type=jnp.float32)
    h = jnp.dot(a, h.astype(jnp.bfloat16), preferred_element_type=jnp.float32)
    h = h + b1_ref[...]                               # [N, 128] f32

    # ---- relu (f32 on VPU) ----
    h = jnp.maximum(h, 0.0)

    # ---- dropout: identity (eval semantics) ----

    # ---- conv2: A_hat @ (H @ W2) + b2 ----
    z = jnp.dot(h.astype(jnp.bfloat16), w2_ref[...],
                preferred_element_type=jnp.float32)
    z = jnp.dot(a, z.astype(jnp.bfloat16), preferred_element_type=jnp.float32)
    z = z + b2_ref[...]                               # [N, 128] f32

    # ---- log_softmax over the real classes (padded lanes masked out) ----
    cls = lax.broadcasted_iota(jnp.int32, z.shape, 1)
    valid = cls < NUM_CLASSES                         # [N, 128] bool
    zm = jnp.where(valid, z, NEG_BIG)
    m = jnp.max(zm, axis=1, keepdims=True)
    e = jnp.exp(zm - m)                               # padded lanes -> ~0
    lse = jnp.log(jnp.sum(e, axis=1, keepdims=True)) + m
    lsm = jnp.where(valid, z - lse, 0.0)              # [N, 128], 0 in pad lanes

    # ---- torch.sum(x.transpose(0,1), dim=1) / N, reshaped -> (1, 128) slab ----
    inv_n = 1.0 / float(z.shape[0])                   # compile-time constant
    o_ref[...] = jnp.sum(lsm, axis=0, keepdims=True) * inv_n


def gcn_forward(x, a_hat, w1, b1, w2, b2):
    """x:[N,F] f32, a_hat:[N,N] f32, w1:[F,H] f32, b1:[H], w2:[H,C] f32, b2:[C]."""
    n, f = x.shape
    hidden = w1.shape[1]
    out_c = w2.shape[1]

    # Lane-dense zero padding of hidden / class dims to 128.
    w1p = jnp.zeros((f, LANE), jnp.float32).at[:, :hidden].set(w1)
    b1p = jnp.zeros((1, LANE), jnp.float32).at[:, :hidden].set(b1.reshape(1, -1))
    w2p = jnp.zeros((LANE, LANE), jnp.float32).at[:hidden, :out_c].set(w2)
    b2p = jnp.zeros((1, LANE), jnp.float32).at[:, :out_c].set(b2.reshape(1, -1))

    # bf16 MXU inputs (f32 accumulate inside the kernel); biases stay f32.
    a_bf = a_hat.astype(jnp.bfloat16)
    x_bf = x.astype(jnp.bfloat16)
    w1_bf = w1p.astype(jnp.bfloat16)
    w2_bf = w2p.astype(jnp.bfloat16)

    vmem = pl.BlockSpec(memory_space=pltpu.MemorySpace.VMEM)
    out_pad = pl.pallas_call(
        gcn_kernel,
        out_shape=jax.ShapeDtypeStruct((1, LANE), jnp.float32),
        in_specs=[vmem] * 6,
        out_specs=vmem,
    )(a_bf, x_bf, w1_bf, b1p, w2_bf, b2p)

    return out_pad[:, :NUM_CLASSES]                   # (1, 10)


def build_normalized_adjacency(edge_index, num_nodes):
    """Dense D^-1/2 (A + I) D^-1/2 matching PyG GCNConv's gcn_norm."""
    src, dst = edge_index[0], edge_index[1]
    a = jnp.zeros((num_nodes, num_nodes), jnp.float32)
    a = a.at[dst, src].add(1.0)                       # aggregate source -> target
    a = a + jnp.eye(num_nodes, dtype=jnp.float32)     # self loops
    deg = jnp.sum(a, axis=1)
    dinv = jnp.where(deg > 0, 1.0 / jnp.sqrt(deg), 0.0)
    return dinv[:, None] * a * dinv[None, :]


def glorot(key, shape):
    fan_in, fan_out = shape
    limit = (6.0 / (fan_in + fan_out)) ** 0.5
    return jax.random.uniform(key, shape, jnp.float32, -limit, limit)


def gcn_reference(x, a_hat, w1, b1, w2, b2):
    """Pure-JAX f32 reference of the torch forward (eval-mode dropout)."""
    h = a_hat @ (x @ w1) + b1.reshape(1, -1)
    h = jnp.maximum(h, 0.0)
    z = a_hat @ (h @ w2) + b2.reshape(1, -1)
    lsm = jax.nn.log_softmax(z, axis=1)
    return (jnp.sum(lsm, axis=0) / x.shape[0]).reshape(1, NUM_CLASSES)


if __name__ == "__main__":
    key = jax.random.PRNGKey(0)
    k_x, k_w1, k_w2 = jax.random.split(key, 3)

    num_nodes = 16
    hidden_channels = 32
    out_channels = NUM_CLASSES

    # deterministic node features and a simple bidirectional ring graph
    x = jax.random.normal(k_x, (num_nodes, NUM_NODE_FEATURES), jnp.float32)
    idx = jnp.arange(num_nodes)
    src = jnp.concatenate([idx, (idx + 1) % num_nodes])
    dst = jnp.concatenate([(idx + 1) % num_nodes, idx])
    edge_index = jnp.stack([src, dst])                # [2, 2*N]

    # GCNConv params: Linear weight (glorot), bias zeros — deterministic init
    w1 = glorot(k_w1, (NUM_NODE_FEATURES, hidden_channels))
    b1 = jnp.zeros((hidden_channels,), jnp.float32)
    w2 = glorot(k_w2, (hidden_channels, out_channels))
    b2 = jnp.zeros((out_channels,), jnp.float32)

    a_hat = build_normalized_adjacency(edge_index, num_nodes)

    out = gcn_forward(x, a_hat, w1, b1, w2, b2)
    jax.block_until_ready(out)

    assert out.shape == (1, NUM_CLASSES) and out.dtype == jnp.float32
    ref = gcn_reference(x, a_hat, w1, b1, w2, b2)
    assert bool(jnp.all(jnp.isfinite(out)))
    # bf16 MXU inputs w/ f32 accumulate -> loose tolerance vs f32 reference
    assert bool(jnp.allclose(out, ref, rtol=5e-2, atol=1e-1))
    print("KERNEL_OK")
</pallas_src>

<mosaic_0001>
module attributes {stable_mosaic.version = 11 : i64} {
  func.func @gcn_kernel(%arg0: memref<16x16xbf16, #tpu.memory_space<vmem>>, %arg1: memref<16x64xbf16, #tpu.memory_space<vmem>>, %arg2: memref<64x128xbf16, #tpu.memory_space<vmem>>, %arg3: memref<1x128xf32, #tpu.memory_space<vmem>>, %arg4: memref<128x128xbf16, #tpu.memory_space<vmem>>, %arg5: memref<1x128xf32, #tpu.memory_space<vmem>>, %arg6: memref<1x128xf32, #tpu.memory_space<vmem>>) attributes {dimension_semantics = [], scalar_prefetch = 0 : i64, scratch_operands = 0 : i64, tpu.core_type = #tpu.core_type<tc>} {
    %c0 = arith.constant 0 : index
    %c0_0 = arith.constant 0 : index
    %0 = vector.load %arg0[%c0, %c0_0] : memref<16x16xbf16, #tpu.memory_space<vmem>>, vector<16x16xbf16>
    %c0_1 = arith.constant 0 : index
    %c0_2 = arith.constant 0 : index
    %1 = vector.load %arg1[%c0_1, %c0_2] : memref<16x64xbf16, #tpu.memory_space<vmem>>, vector<16x64xbf16>
    %c0_3 = arith.constant 0 : index
    %c0_4 = arith.constant 0 : index
    %2 = vector.load %arg2[%c0_3, %c0_4] : memref<64x128xbf16, #tpu.memory_space<vmem>>, vector<64x128xbf16>
    %cst = arith.constant dense<0.000000e+00> : vector<16x128xf32>
    %3 = tpu.matmul %1, %2, %cst {dimension_numbers = #tpu.dot_dimension_numbers<[1], [0], [0], [1], [0, 0, 1, 1], [], []>} : vector<16x64xbf16>, vector<64x128xbf16>, vector<16x128xf32> -> vector<16x128xf32>
    %4 = arith.truncf %3 : vector<16x128xf32> to vector<16x128xbf16>
    %cst_5 = arith.constant dense<0.000000e+00> : vector<16x128xf32>
    %5 = tpu.matmul %0, %4, %cst_5 {dimension_numbers = #tpu.dot_dimension_numbers<[1], [0], [0], [1], [0, 0, 1, 1], [], []>} : vector<16x16xbf16>, vector<16x128xbf16>, vector<16x128xf32> -> vector<16x128xf32>
    %c0_6 = arith.constant 0 : index
    %c0_7 = arith.constant 0 : index
    %6 = vector.load %arg3[%c0_6, %c0_7] : memref<1x128xf32, #tpu.memory_space<vmem>>, vector<1x128xf32>
    %7 = vector.broadcast %6 : vector<1x128xf32> to vector<16x128xf32>
    %8 = arith.addf %5, %7 : vector<16x128xf32>
    %cst_8 = arith.constant 0.000000e+00 : f32
    %9 = vector.broadcast %cst_8 : f32 to vector<16x128xf32>
    %10 = arith.maximumf %8, %9 : vector<16x128xf32>
    %11 = arith.truncf %10 : vector<16x128xf32> to vector<16x128xbf16>
    %c0_9 = arith.constant 0 : index
    %c0_10 = arith.constant 0 : index
    %12 = vector.load %arg4[%c0_9, %c0_10] : memref<128x128xbf16, #tpu.memory_space<vmem>>, vector<128x128xbf16>
    %cst_11 = arith.constant dense<0.000000e+00> : vector<16x128xf32>
    %13 = tpu.matmul %11, %12, %cst_11 {dimension_numbers = #tpu.dot_dimension_numbers<[1], [0], [0], [1], [0, 0, 1, 1], [], []>} : vector<16x128xbf16>, vector<128x128xbf16>, vector<16x128xf32> -> vector<16x128xf32>
    %14 = arith.truncf %13 : vector<16x128xf32> to vector<16x128xbf16>
    %cst_12 = arith.constant dense<0.000000e+00> : vector<16x128xf32>
    %15 = tpu.matmul %0, %14, %cst_12 {dimension_numbers = #tpu.dot_dimension_numbers<[1], [0], [0], [1], [0, 0, 1, 1], [], []>} : vector<16x16xbf16>, vector<16x128xbf16>, vector<16x128xf32> -> vector<16x128xf32>
    %c0_13 = arith.constant 0 : index
    %c0_14 = arith.constant 0 : index
    %16 = vector.load %arg5[%c0_13, %c0_14] : memref<1x128xf32, #tpu.memory_space<vmem>>, vector<1x128xf32>
    %17 = vector.broadcast %16 : vector<1x128xf32> to vector<16x128xf32>
    %18 = arith.addf %15, %17 : vector<16x128xf32>
    %19 = tpu.iota {dimensions = array<i32: 1>} : vector<16x128xi32>
    %c10_i32 = arith.constant 10 : i32
    %20 = vector.broadcast %c10_i32 : i32 to vector<16x128xi32>
    %21 = arith.cmpi slt, %19, %20 : vector<16x128xi32>
    %cst_15 = arith.constant -1.000000e+30 : f32
    %22 = vector.broadcast %cst_15 : f32 to vector<16x128xf32>
    %23 = arith.select %21, %18, %22 : vector<16x128xi1>, vector<16x128xf32>
    %cst_16 = arith.constant dense<0xFF800000> : vector<16xf32>
    %24 = vector.multi_reduction <maximumf>, %23, %cst_16 [1] : vector<16x128xf32> to vector<16xf32>
    %25 = vector.shape_cast %24 : vector<16xf32> to vector<16x1xf32>
    %26 = vector.broadcast %25 : vector<16x1xf32> to vector<16x128xf32>
    %27 = arith.subf %23, %26 : vector<16x128xf32>
    %28 = math.exp %27 : vector<16x128xf32>
    %cst_17 = arith.constant dense<0.000000e+00> : vector<16xf32>
    %29 = vector.multi_reduction <add>, %28, %cst_17 [1] : vector<16x128xf32> to vector<16xf32>
    %30 = vector.shape_cast %29 : vector<16xf32> to vector<16x1xf32>
    %31 = math.log %30 : vector<16x1xf32>
    %32 = arith.addf %31, %25 : vector<16x1xf32>
    %33 = vector.broadcast %32 : vector<16x1xf32> to vector<16x128xf32>
    %34 = arith.subf %18, %33 : vector<16x128xf32>
    %cst_18 = arith.constant 0.000000e+00 : f32
    %35 = vector.broadcast %cst_18 : f32 to vector<16x128xf32>
    %36 = arith.select %21, %34, %35 : vector<16x128xi1>, vector<16x128xf32>
    %cst_19 = arith.constant dense<0.000000e+00> : vector<128xf32>
    %37 = vector.multi_reduction <add>, %36, %cst_19 [0] : vector<16x128xf32> to vector<128xf32>
    %38 = vector.shape_cast %37 : vector<128xf32> to vector<1x128xf32>
    %cst_20 = arith.constant 6.250000e-02 : f32
    %39 = vector.broadcast %cst_20 : f32 to vector<1x128xf32>
    %40 = arith.mulf %38, %39 : vector<1x128xf32>
    %c0_21 = arith.constant 0 : index
    %c0_22 = arith.constant 0 : index
    %41 = vector.load %arg6[%c0_21, %c0_22] : memref<1x128xf32, #tpu.memory_space<vmem>>, vector<1x128xf32>
    tpu.vector_store %arg6[%c0_21, %c0_22], %40 {strides = array<i32>} : memref<1x128xf32, #tpu.memory_space<vmem>>, vector<1x128xf32>,
    return
  }
}

</mosaic_0001>

<bundles_post_ra>
// kernel: tpu_custom_call.1
= control target key start
LH: loop header
LB: loop body
LE: loop exit
PB: predicated region body
PF: predicated region fallthrough
CT: control target
= control target key end

     0   :  { %11 = vsyncpa [#allocation3], 0  ;;  %s743_s0 = inlined_call_operand.hbm [shape: bf16[16,16], index: 0, kind: input, shape index: {}]   ;;  %s744_s1 = inlined_call_operand.hbm [shape: bf16[16,64], index: 1, kind: input, shape index: {}]   ;;  %s745_s2 = inlined_call_operand.hbm [shape: bf16[64,128], index: 2, kind: input, shape index: {}]   ;;  %s746_s3 = inlined_call_operand.vmem [shape: f32[1,128], index: 3, kind: input, shape index: {}]   ;;  %s747_s4 = inlined_call_operand.hbm [shape: bf16[128,128], index: 4, kind: input, shape index: {}]   ;;  %s748_s5 = inlined_call_operand.vmem [shape: f32[1,128], index: 5, kind: input, shape index: {}]   ;;  %s749_s6 = inlined_call_operand.hbm [shape: f32[1,128], index: 6, kind: output, shape index: {}]  }
   0x1   :  { %12 = vsyncpa [#allocation6], 0 }
   0x2   :  { %13 = vsyncpa [#allocation9], 0 }
   0x3   :  { %14 = vsyncpa [#allocation4], 0  ;;  %s656_s21 = smov [#allocation5]   ;;  %s657_s23 = smov [#allocation2]  }
   0x4   :  { %s32_s22 = sshll.u32 %s656_s21, 4  ;;  %s20_s24 = sshll.u32 %s657_s23, 4  ;;  %s33_s22 = int_to_ptr.vmem [resolvable:$true] %s32_s22  ;;  %s21_s24 = int_to_ptr.vmem [resolvable:$true] %s20_s24 }
   0x5   :  { %s556_s25 = scalar_lea.vmem %s33_s22, 128  ;;  %p561_p1 = scmp.lt.s32.totalorder %s33_s22, %s33_s22 }
   0x6   :  { %p557_p0 = scmp.ne.s32.totalorder %s33_s22, %s556_s25  ;;  %p562_p2 = scmp.lt.s32.totalorder %s556_s25, %s556_s25 }
   0x8   :  { %p563_p3 = por %p562_p2, %p561_p1 }
   0xa   :  { %p564_p4 = pnand %p563_p3, %p557_p0 }
   0xc   :  { %567 = shalt.err (!%p564_p4)
}
   0xd   :  { %s658_s26 = smov 64   ;;  %s659_s27 = smov 4  }
   0xe   :  { %38 = dma.hbm_to_vmem [thread:$0]  %s744_s1, 128, %s33_s22, [#allocation6], %s658_s26, %s658_s26, %s659_s27  }
   0xf   :  { %s576_s30 = scalar_lea.vmem %s21_s24, 128  ;;  %p581_p6 = scmp.lt.s32.totalorder %s21_s24, %s21_s24 }
  0x10   :  { %p577_p5 = scmp.ne.s32.totalorder %s21_s24, %s576_s30  ;;  %p582_p7 = scmp.lt.s32.totalorder %s576_s30, %s576_s30 }
  0x12   :  { %p583_p8 = por %p582_p7, %p581_p6 }
  0x14   :  { %p584_p9 = pnand %p583_p8, %p577_p5 }
  0x16   :  { %587 = shalt.err (!%p584_p9)
}
  0x17   :  { %26 = dma.hbm_to_vmem [thread:$0]  %s743_s0, 128, %s21_s24, [#allocation3], %s658_s26, %s658_s26, %s659_s27  }
  0x18   :  { %s660_s9 = smov [#allocation7]   ;;  %s661_s11 = smov [#allocation8]  }
  0x19   :  { %s44_s10 = sshll.u32 %s660_s9, 4  ;;  %s58_s12 = sshll.u32 %s661_s11, 4  ;;  %s45_s10 = int_to_ptr.vmem [resolvable:$true] %s44_s10  ;;  %s59_s12 = int_to_ptr.vmem [resolvable:$true] %s58_s12 }
  0x1a   :  { %s596_s1 = scalar_lea.vmem %s45_s10, 512  ;;  %p601_p11 = scmp.lt.s32.totalorder %s45_s10, %s45_s10 }
  0x1b   :  { %p597_p10 = scmp.ne.s32.totalorder %s45_s10, %s596_s1  ;;  %p602_p12 = scmp.lt.s32.totalorder %s596_s1, %s596_s1 }
  0x1d   :  { %p603_p13 = por %p602_p12, %p601_p11 }
  0x1f   :  { %p604_p0 = pnand %p603_p13, %p597_p10 }
  0x21   :  { %607 = shalt.err (!%p604_p0)
}
  0x22   :  { %50 = dma.hbm_to_vmem [thread:$0]  %s745_s2, 512, %s45_s10, [#allocation6], %s658_s26, %s658_s26, %s659_s27  }
  0x23   :  { %s616_s0 = scalar_lea.vmem %s59_s12, 1024  ;;  %p621_p2 = scmp.lt.s32.totalorder %s59_s12, %s59_s12 }
  0x24   :  { %p617_p1 = scmp.ne.s32.totalorder %s59_s12, %s616_s0  ;;  %p622_p3 = scmp.lt.s32.totalorder %s616_s0, %s616_s0 }
  0x26   :  { %p623_p4 = por %p622_p3, %p621_p2 }
  0x28   :  { %p624_p5 = pnand %p623_p4, %p617_p1 }
  0x2a   :  { %627 = shalt.err (!%p624_p5)
}
  0x2b   :  { %64 = dma.hbm_to_vmem [thread:$0]  %s747_s4, 1024, %s59_s12, [#allocation9], %s658_s26, %s658_s26, %s659_s27  }
  0x2c   :  { %648 = dma.done.wait [#allocation3], 128  }
  0x2d   :  { %649 = vsyncadd [#allocation3], 4294967168 }
  0x2e   :  { %650 = dma.done.wait [#allocation6], 640  }
  0x2f   :  { %651 = vsyncadd [#allocation6], 4294966656 }
  0x30   :  { %652 = dma.done.wait [#allocation9], 1024  }
  0x31   :  { %653 = vsyncadd [#allocation9], 4294966272  ;;  %v662_v0 = vmov 0.0   ;;  %vm663_vm0 = vmmov 0   ;;  %v526_v1 = vld [vmem:[#allocation7 + $0x18] sm:$0xff]   ;;  %v527_v2 = vld [vmem:[#allocation7 + $0x10] sm:$0xff]   ;;  %v381_v35 = vlaneseq }
  0x32   :  { %473 = vmatprep.subr.bf16.mxu0 %v662_v0  ;;  %481 = vmatprep.mubr.msk.bf16.mxu0 %vm663_vm0, %v662_v0  ;;  %v528_v3 = vld [vmem:[#allocation7 + $0x8] sm:$0xff]   ;;  %v529_v4 = vld [vmem:[#allocation7] sm:$0xff]   ;;  %v530_v5 = vld [vmem:[#allocation5] sm:$0xff]   ;;  %vm121_vm1 = vcmask 523264   ;;  %vm179_vm2 = vcmask 130048  }
  0x33   :  { %491 = vmatprep.subr.bf16.mxu1 %v662_v0  ;;  %507 = vmatprep.mubr.msk.bf16.mxu1 %vm663_vm0, %v662_v0  ;;  %v532_v6 = vld [vmem:[#allocation8 + $0x38] sm:$0xff]   ;;  %v533_v7 = vld [vmem:[#allocation8 + $0x30] sm:$0xff]   ;;  %v534_v8 = vld [vmem:[#allocation8 + $0x28] sm:$0xff]   ;;  %v382_v36 = vand.u32 127, %v381_v35 }
  0x34   :  { %474 = vmatpush3.bf16.msra.mxu0 %v526_v1  ;;  %492 = vmatpush3.bf16.msra.mxu1 %v532_v6  ;;  %v535_v9 = vld [vmem:[#allocation8 + $0x20] sm:$0xff]   ;;  %v536_v10 = vld [vmem:[#allocation8 + $0x18] sm:$0xff]   ;;  %v531_v16 = vld [vmem:[#allocation2] sm:$0xff]  }
  0x35   :  { %475 = vmatprep.subr.bf16.mxu0 %v662_v0  ;;  %493 = vmatprep.subr.bf16.mxu1 %v662_v0  ;;  %v537_v17 = vld [vmem:[#allocation8 + $0x10] sm:$0xff]   ;;  %v538_v18 = vld [vmem:[#allocation8 + $0x8] sm:$0xff]   ;;  %v539_v19 = vld [vmem:[#allocation8] sm:$0xff]   ;;  %vm383_vm3 = vcmp.lt.s32.totalorder %v382_v36, 10 }
  0x36   :  { %v442_v20 = vld [vmem:[%s746_s3] ss:$0 sm:$0xff] }
  0x37   :  { %v453_v37 = vld [vmem:[%s748_s5] ss:$0 sm:$0xff]  ;;  %s664_s5 = smov [#allocation10]  }
  0x38   :  { %476 = vmatpush3.bf16.msra.mxu0 %v527_v2  ;;  %494 = vmatpush3.bf16.msra.mxu1 %v533_v7  ;;  %s425_s18 = sshll.u32 %s664_s5, 4  ;;  %s426_s18 = int_to_ptr.vmem [resolvable:$true] %s425_s18 }
  0x39   :  { %477 = vmatprep.subr.bf16.mxu0 %v662_v0  ;;  %495 = vmatprep.subr.bf16.mxu1 %v662_v0  ;;  %s628_s19 = scalar_lea.vmem %s426_s18, 16  ;;  %s632_s20 = scalar_lea.vmem %s426_s18, 32 }
  0x3a   :  { %p629_p6 = scmp.ne.s32.totalorder %s426_s18, %s628_s19  ;;  %p633_p7 = scmp.lt.s32.totalorder %s426_s18, %s426_s18 }
  0x3b   :  { %p634_p8 = scmp.lt.s32.totalorder %s632_s20, %s628_s19 }
  0x3c   :  { %478 = vmatpush3.bf16.msra.mxu0 %v528_v3  ;;  %496 = vmatpush3.bf16.msra.mxu1 %v534_v8 }
  0x3d   :  { %479 = vmatprep.subr.bf16.mxu0 %v662_v0  ;;  %497 = vmatprep.subr.bf16.mxu1 %v662_v0  ;;  %p635_p9 = por %p634_p8, %p633_p7 }
  0x3f   :  { %p636_p10 = pnand %p635_p9, %p629_p6 }
  0x40   :  { %480 = vmatpush3.bf16.msra.mxu0 %v529_v4  ;;  %498 = vmatpush3.bf16.msra.mxu1 %v535_v9 }
  0x41   :  { %485 = vmatprep.subr.bf16.mxu0 %v662_v0  ;;  %499 = vmatprep.subr.bf16.mxu1 %v662_v0 }
  0x43   :  { %482 = vmatmul.mubr.msk.bf16.vlgmr.msra.gmra.mxu0 %vm121_vm1, %v530_v5 }
  0x44   :  { %487 = vmatprep.mubr.msk.bf16.mxu0 %vm663_vm0, %v662_v0  ;;  %500 = vmatpush3.bf16.msra.mxu1 %v536_v10 }
  0x45   :  { %501 = vmatprep.subr.bf16.mxu1 %v662_v0 }
  0x48   :  { %502 = vmatpush3.bf16.msra.mxu1 %v537_v17 }
  0x49   :  { %503 = vmatprep.subr.bf16.mxu1 %v662_v0 }
  0x4c   :  { %504 = vmatpush3.bf16.msra.mxu1 %v538_v18 }
  0x4d   :  { %505 = vmatprep.subr.bf16.mxu1 %v662_v0 }
  0x50   :  { %506 = vmatpush3.bf16.msra.mxu1 %v539_v19 }
 0x103   :  { %v159_v11 = vpop.f32.mrf.mxu0 }
 0x105   :  { %v483_v12 = vpop.f32.mrf.mxu0 }
 0x107   :  { %v162_v13 = vpop.f32.mrf.mxu0 }
 0x108   :  { %v166_v14 = vpack.c.bf16 %v162_v13, %v159_v11 }
 0x109   :  { %v484_v15 = vpop.f32.mrf.mxu0 }
 0x10a   :  { %486 = vmatpush3.bf16.msra.mxu0 %v166_v14 }
 0x10b   :  { %511 = vmatprep.subr.bf16.mxu0 %v662_v0 }
 0x10d   :  { %488 = vmatmul.mubr.msk.bf16.vlgmr.msra.gmra.mxu0 %vm179_vm2, %v531_v16 }
 0x10e   :  { %513 = vmatprep.mubr.msk.bf16.mxu0 %vm663_vm0, %v662_v0 }
 0x1cd   :  { %v217_v21 = vpop.f32.mrf.mxu0 }
 0x1ce   :  { %v218_v23 = vadd.f32 %v442_v20, %v217_v21 }
 0x1cf   :  { %v489_v22 = vpop.f32.mrf.mxu0 }
 0x1d0   :  { %v224_v27 = vmax.f32 %v218_v23, 0.0 }
 0x1d1   :  { %v220_v24 = vpop.f32.mrf.mxu0 }
 0x1d2   :  { %v221_v25 = vadd.f32 %v442_v20, %v220_v24 }
 0x1d3   :  { %v490_v26 = vpop.f32.mrf.mxu0 }
 0x1d4   :  { %v225_v28 = vmax.f32 %v221_v25, 0.0 }
 0x1d6   :  { %v226_v29 = vpack.c.bf16 %v225_v28, %v224_v27 }
 0x1d8   :  { %508 = vmatmul.mubr.bf16.vlgmr.msra.gmra.mxu1 %v226_v29 }
 0x298   :  { %v325_v30 = vpop.f32.mrf.mxu1 }
 0x29a   :  { %v509_v31 = vpop.f32.mrf.mxu1 }
 0x29c   :  { %v328_v32 = vpop.f32.mrf.mxu1 }
 0x29d   :  { %v332_v33 = vpack.c.bf16 %v328_v32, %v325_v30 }
 0x29e   :  { %v510_v34 = vpop.f32.mrf.mxu1 }
 0x29f   :  { %512 = vmatpush3.bf16.msra.mxu0 %v332_v33 }
 0x2a2   :  { %514 = vmatmul.mubr.msk.bf16.vlgmr.msra.gmra.mxu0 %vm179_vm2, %v531_v16 }
 0x362   :  { %v374_v38 = vpop.f32.mrf.mxu0 }
 0x363   :  { %v375_v39 = vadd.f32 %v453_v37, %v374_v38 }
 0x364   :  { %v515_v40 = vpop.f32.mrf.mxu0 }
 0x365   :  { %v384_v41 = vsel %vm383_vm3, %v375_v39, -1e+30 }
 0x366   :  { %386 = vmax.xlane.f32.xlu0 %v384_v41  ;;  %v377_v42 = vpop.f32.mrf.mxu0 }
 0x367   :  { %v378_v43 = vadd.f32 %v453_v37, %v377_v42 }
 0x368   :  { %v516_v44 = vpop.f32.mrf.mxu0 }
 0x369   :  { %v385_v45 = vsel %vm383_vm3, %v378_v43, -1e+30 }
 0x36a   :  { %388 = vmax.xlane.f32.xlu0 %v385_v45 }
 0x3ef   :  { %v387_v46 = vpop.xlane.xlu0 %386 }
 0x3f0   :  { %v390_v47 = vsub.f32 %v384_v41, %v387_v46 }
 0x3f2   :  { %v392_v48 = vmul.f32 1.442695, %v390_v47 }
 0x3f3   :  { %v389_v49 = vpop.xlane.xlu0 %388 }
 0x3f4   :  { %540 = vpow2.f32 %v392_v48  ;;  %v391_v50 = vsub.f32 %v385_v45, %v389_v49 }
 0x3f6   :  { %v394_v51 = vmul.f32 1.442695, %v391_v50 }
 0x3f8   :  { %542 = vpow2.f32 %v394_v51 }
 0x401   :  { %v541_v52 = vpop.eup %540 }
 0x402   :  { %396 = vadd.xlane.f32.xlu1 %v541_v52 }
 0x405   :  { %v543_v53 = vpop.eup %542 }
 0x406   :  { %398 = vadd.xlane.f32.xlu1 %v543_v53 }
 0x48b   :  { %v397_v54 = vpop.xlane.xlu1 %396 }
 0x48c   :  { %544 = vlog2.f32 %v397_v54 }
 0x48f   :  { %v399_v55 = vpop.xlane.xlu1 %398 }
 0x490   :  { %546 = vlog2.f32 %v399_v55 }
 0x499   :  { %v545_v56 = vpop.eup %544 }
 0x49a   :  { %v401_v57 = vmul.f32 0.6931472, %v545_v56 }
 0x49c   :  { %v404_v58 = vadd.f32 %v401_v57, %v387_v46 }
 0x49d   :  { %v547_v59 = vpop.eup %546 }
 0x49e   :  { %v403_v60 = vmul.f32 0.6931472, %v547_v59  ;;  %v406_v61 = vsub.f32 %v375_v39, %v404_v58 }
 0x4a0   :  { %v405_v62 = vadd.f32 %v403_v60, %v389_v49  ;;  %v408_v0 = vsel %vm383_vm3, %v406_v61, 0.0 }
 0x4a2   :  { %v407_v63 = vsub.f32 %v378_v43, %v405_v62 }
 0x4a4   :  { %v409_v1 = vsel %vm383_vm3, %v407_v63, 0.0 }
 0x4a5   :  { %v410_v2 = vadd.f32 %v409_v1, %v408_v0 }
 0x4a7   :  { %v411_v3 = vrot.slane %v410_v2, 4 }
 0x4a9   :  { %v412_v4 = vadd.f32 %v411_v3, %v410_v2 }
 0x4ab   :  { %v413_v5 = vrot.slane %v412_v4, 2 }
 0x4ad   :  { %v414_v6 = vadd.f32 %v413_v5, %v412_v4 }
 0x4af   :  { %v415_v7 = vrot.slane %v414_v6, 1 }
 0x4b1   :  { %v416_v8 = vadd.f32 %v415_v7, %v414_v6 }
 0x4b3   :  { %v417_v9 = vmul.f32 0.0625, %v416_v8 }
 0x4b5   :  { %418 = vst [vmem:[#allocation10] sm:$0x1] %v417_v9 }
 0x4b6   :  { %639 = shalt.err (!%p636_p10)
}
 0x4b7   :  { %428 = dma.vmem_to_hbm [thread:$0]  %s426_s18, 16, %s749_s6, [#allocation4]  }
 0x4b8   :  { %654 = dma.done.wait [#allocation4], 16  }
 0x4b9   :  { %655 = vsyncadd [#allocation4], 4294967280 }
 0x4ba   :  { %432 = vsyncpa [#allocation3], 1 }
 0x4bb   :  { %433 = vsyncpa [#allocation6], 1 }
 0x4bc   :  { %434 = vsyncpa [#allocation9], 1 }
 0x4bd   :  { %435 = vsyncpa [#allocation4], 1 }

</bundles_post_ra>
